<compile_context>
chip_gen: v7x
topology: tpu7x:2x2x1
jax: 0.10.0
libtpu: 0.0.40
codegen_flags: <defaults>
</compile_context>

<pallas_src>
import jax
import jax.numpy as jnp
import numpy as np
from jax import lax
from jax.experimental import pallas as pl
from jax.experimental.pallas import tpu as pltpu


def _make_kernel(num_layers, n, hh, ww, c_out, dil, eps):
    hw = hh * ww
    L = n * hw
    taps = [((ki - 1) * dil, (kj - 1) * dil) for ki in range(3) for kj in range(3)]
    inv_count = 1.0 / float(n * hw)

    def kernel(*refs):
        xpad_ref = refs[0]                          # (c_out, L) f32, channel-padded input
        mask_ref = refs[1]                          # (9, L)    f32 border-validity masks
        per_layer = refs[2:2 + 3 * num_layers]      # (gamma, beta, w) per layer
        o_ref = refs[2 + 3 * num_layers]            # (c_out, L)
        p_ref = refs[3 + 3 * num_layers]            # (9*c_out, L) f32 im2col scratch

        xpad = xpad_ref[...]                        # kept for the residual add
        cur = xpad                                  # (c_out, L) f32
        for l in range(num_layers):
            gamma = per_layer[3 * l][...]           # (c_out, 1) f32 (zero on padded ch.)
            beta = per_layer[3 * l + 1][...]        # (c_out, 1) f32
            w_ref = per_layer[3 * l + 2]            # (c_out, 9*c_out) bf16

            # ---- one-pass BatchNorm (training-mode stats, biased var) + ReLU ----
            mean = jnp.sum(cur, axis=1, keepdims=True) * inv_count          # (c,1)
            ex2 = jnp.sum(cur * cur, axis=1, keepdims=True) * inv_count     # (c,1)
            var = ex2 - mean * mean
            scale = gamma * lax.rsqrt(var + eps)                            # (c,1)
            shift = beta - mean * scale
            h = jnp.maximum(cur * scale + shift, 0.0)                       # (c, L) f32

            # ---- im2col: roll (XLU) + mask, one full-width aligned store per tap ----
            # Row block t of P holds h shifted by s = dy*W + dx along the flattened
            # (batch-folded) spatial axis; the mask zeroes every position whose tap
            # falls outside its own image, which also covers roll wrap-around.
            for t, (dy, dx) in enumerate(taps):
                s = dy * ww + dx
                r0 = t * c_out
                if s == 0:
                    p_ref[r0:r0 + c_out, :] = h
                else:
                    m = mask_ref[t:t + 1, :]                                # (1, L)
                    p_ref[r0:r0 + c_out, :] = pltpu.roll(
                        h, shift=(-s) % L, axis=1) * m

            # ---- dilated 3x3 conv: ONE bf16 MXU matmul for the whole layer ----
            cur = jnp.dot(w_ref[...], p_ref[...].astype(jnp.bfloat16),
                          preferred_element_type=jnp.float32)               # (c_out, L)

        # ---- residual 'pad' shortcut: padded input == xpad -> one full store ----
        o_ref[...] = (cur + xpad).astype(o_ref.dtype)

    return kernel


def residual_block_forward(x_nchw, gammas, betas, weights_hwio, *, dilation, eps=1e-5):
    """x: (N, C_in, H, W).  weights_hwio[l]: (3, 3, C_l, C_out), i.e. torch's OIHW
    conv weight transposed by (2, 3, 1, 0).  gammas/betas[l]: (C_l,)."""
    n, c_in, hh, ww = x_nchw.shape
    c_out = weights_hwio[0].shape[-1]
    num_layers = len(weights_hwio)
    hw = hh * ww
    L = n * hw
    assert c_out >= c_in and (c_out - c_in) % 2 == 0
    half = (c_out - c_in) // 2

    # ---- lane-dense, batch-folded layout: (C, N*H*W); channel-pad to c_out ----
    # Real channels sit at rows [half, half+c_in): the padded tensor is exactly
    # torch.cat((zeros_half, x, zeros_half), dim=1), i.e. the residual shortcut.
    x_cl = jnp.transpose(x_nchw.reshape(n, c_in, hw), (1, 0, 2)).reshape(c_in, L)
    xpad = jnp.zeros((c_out, L), jnp.float32).at[half:half + c_in, :].set(
        x_cl.astype(jnp.float32))

    # ---- border-validity masks over the flattened spatial axis, tiled per batch ----
    yy, xx = np.meshgrid(np.arange(hh), np.arange(ww), indexing="ij")
    masks = []
    for ki in range(3):
        for kj in range(3):
            dy, dx = (ki - 1) * dilation, (kj - 1) * dilation
            valid = ((yy + dy >= 0) & (yy + dy < hh) &
                     (xx + dx >= 0) & (xx + dx < ww))
            masks.append(valid.reshape(-1))
    mask_img = np.stack(masks).astype(np.float32)          # (9, hw)
    mask = jnp.asarray(np.tile(mask_img, (1, n)))          # (9, n*hw)

    inputs = [xpad, mask]
    cin, off = c_in, half
    for g, b, w in zip(gammas, betas, weights_hwio):
        # Pad gamma/beta/weight channel dim from cin to c_out (zeros outside
        # [off, off+cin)): padded channels stay exactly zero through BN+ReLU and
        # their zero weight K-columns contribute nothing to the conv.
        gp = jnp.zeros((c_out,), jnp.float32).at[off:off + cin].set(g.astype(jnp.float32))
        bp = jnp.zeros((c_out,), jnp.float32).at[off:off + cin].set(b.astype(jnp.float32))
        wp = jnp.zeros((3, 3, c_out, c_out), jnp.float32).at[:, :, off:off + cin, :].set(
            w.astype(jnp.float32))
        # (3,3,Cp,c_out) -> (c_out, 9*Cp): conv becomes one matmul vs the im2col block.
        w2 = jnp.transpose(wp, (3, 0, 1, 2)).reshape(c_out, 9 * c_out)
        inputs += [gp.reshape(c_out, 1), bp.reshape(c_out, 1), w2.astype(jnp.bfloat16)]
        cin, off = c_out, 0

    vmem = pl.BlockSpec(memory_space=pltpu.MemorySpace.VMEM)
    out_cl = pl.pallas_call(
        _make_kernel(num_layers, n, hh, ww, c_out, dilation, eps),
        out_shape=jax.ShapeDtypeStruct((c_out, L), x_nchw.dtype),
        in_specs=[vmem] * len(inputs),
        out_specs=vmem,
        scratch_shapes=[
            # One f32 im2col scratch shared by all layers; every tap store is a
            # full-width, (8,128)-aligned, unmasked store.
            pltpu.VMEM((9 * c_out, L), jnp.float32)],
    )(*inputs)

    # (c_out, N*HW) -> (N, c_out, H, W): wrapper-side layout plumbing only.
    return jnp.transpose(out_cl.reshape(c_out, n, hh, ww), (1, 0, 2, 3))


def _reference_forward(x, gammas, betas, weights_hwio, *, dilation, eps=1e-5):
    """Pure-JAX f32 reference of the PyTorch module's forward."""
    out = x
    for g, b, w in zip(gammas, betas, weights_hwio):
        mean = out.mean(axis=(0, 2, 3), keepdims=True)
        var = ((out - mean) ** 2).mean(axis=(0, 2, 3), keepdims=True)
        h = (out - mean) * (g.reshape(1, -1, 1, 1) * lax.rsqrt(var + eps)) \
            + b.reshape(1, -1, 1, 1)
        h = jnp.maximum(h, 0.0)
        out = lax.conv_general_dilated(
            h, w, window_strides=(1, 1),
            padding=[(dilation, dilation), (dilation, dilation)],
            rhs_dilation=(dilation, dilation),
            dimension_numbers=("NCHW", "HWIO", "NCHW"),
            precision=lax.Precision.HIGHEST)
    half = (out.shape[1] - x.shape[1]) // 2
    xpad = jnp.pad(x, ((0, 0), (half, half), (0, 0), (0, 0)))
    return out + xpad


if __name__ == "__main__":
    # Module config: ResidualBlock(in_channels=4, out_channels=8, num_layers=2,
    #                              dilation=2, dimensions=2) with defaults
    #                (batch_norm=True, residual=True, residual_type='pad').
    N, C_IN, C_OUT, H, W = 2, 4, 8, 16, 16
    NUM_LAYERS, DIL = 2, 2

    key = jax.random.PRNGKey(0)
    keys = jax.random.split(key, 1 + 3 * NUM_LAYERS)

    x = jax.random.normal(keys[0], (N, C_IN, H, W), jnp.float32)

    gammas, betas, weights = [], [], []
    cin = C_IN
    for l in range(NUM_LAYERS):
        kg, kb, kw = keys[1 + 3 * l], keys[2 + 3 * l], keys[3 + 3 * l]
        gammas.append(1.0 + 0.1 * jax.random.normal(kg, (cin,), jnp.float32))
        betas.append(0.1 * jax.random.normal(kb, (cin,), jnp.float32))
        std = (2.0 / (9.0 * cin)) ** 0.5
        # HWIO layout == torch OIHW conv weight transposed by (2, 3, 1, 0).
        weights.append(std * jax.random.normal(kw, (3, 3, cin, C_OUT), jnp.float32))
        cin = C_OUT

    out = residual_block_forward(x, gammas, betas, weights, dilation=DIL)
    out = jax.block_until_ready(out)
    assert out.shape == (N, C_OUT, H, W)

    # Sanity check vs a pure-JAX f32 reference (kernel matmuls are bf16 with
    # f32 accumulation, so allow a small tolerance).
    ref = jax.block_until_ready(
        _reference_forward(x, gammas, betas, weights, dilation=DIL))
    err = float(jnp.max(jnp.abs(out - ref)))
    assert err < 0.2, f"max abs error vs reference = {err}"

    print("KERNEL_OK")
</pallas_src>

<mosaic_0001>
module attributes {stable_mosaic.version = 11 : i64} {
  func.func @kernel(%arg0: memref<8x512xf32, #tpu.memory_space<vmem>>, %arg1: memref<9x512xf32, #tpu.memory_space<vmem>>, %arg2: memref<8x1xf32, #tpu.memory_space<vmem>>, %arg3: memref<8x1xf32, #tpu.memory_space<vmem>>, %arg4: memref<8x72xbf16, #tpu.memory_space<vmem>>, %arg5: memref<8x1xf32, #tpu.memory_space<vmem>>, %arg6: memref<8x1xf32, #tpu.memory_space<vmem>>, %arg7: memref<8x72xbf16, #tpu.memory_space<vmem>>, %arg8: memref<8x512xf32, #tpu.memory_space<vmem>>, %arg9: memref<72x512xf32, #tpu.memory_space<vmem>>) attributes {dimension_semantics = [], scalar_prefetch = 0 : i64, scratch_operands = 1 : i64, tpu.core_type = #tpu.core_type<tc>} {
    %c0 = arith.constant 0 : index
    %c0_0 = arith.constant 0 : index
    %0 = vector.load %arg0[%c0, %c0_0] : memref<8x512xf32, #tpu.memory_space<vmem>>, vector<8x512xf32>
    %c0_1 = arith.constant 0 : index
    %c0_2 = arith.constant 0 : index
    %1 = vector.load %arg2[%c0_1, %c0_2] : memref<8x1xf32, #tpu.memory_space<vmem>>, vector<8x1xf32>
    %c0_3 = arith.constant 0 : index
    %c0_4 = arith.constant 0 : index
    %2 = vector.load %arg3[%c0_3, %c0_4] : memref<8x1xf32, #tpu.memory_space<vmem>>, vector<8x1xf32>
    %cst = arith.constant dense<0.000000e+00> : vector<8xf32>
    %3 = vector.multi_reduction <add>, %0, %cst [1] : vector<8x512xf32> to vector<8xf32>
    %4 = vector.shape_cast %3 : vector<8xf32> to vector<8x1xf32>
    %cst_5 = arith.constant 0.001953125 : f32
    %5 = vector.broadcast %cst_5 : f32 to vector<8x1xf32>
    %6 = arith.mulf %4, %5 : vector<8x1xf32>
    %7 = arith.mulf %0, %0 : vector<8x512xf32>
    %cst_6 = arith.constant dense<0.000000e+00> : vector<8xf32>
    %8 = vector.multi_reduction <add>, %7, %cst_6 [1] : vector<8x512xf32> to vector<8xf32>
    %9 = vector.shape_cast %8 : vector<8xf32> to vector<8x1xf32>
    %cst_7 = arith.constant 0.001953125 : f32
    %10 = vector.broadcast %cst_7 : f32 to vector<8x1xf32>
    %11 = arith.mulf %9, %10 : vector<8x1xf32>
    %12 = arith.mulf %6, %6 : vector<8x1xf32>
    %13 = arith.subf %11, %12 : vector<8x1xf32>
    %cst_8 = arith.constant 9.99999974E-6 : f32
    %14 = vector.broadcast %cst_8 : f32 to vector<8x1xf32>
    %15 = arith.addf %13, %14 : vector<8x1xf32>
    %16 = math.rsqrt %15 : vector<8x1xf32>
    %17 = arith.mulf %1, %16 : vector<8x1xf32>
    %18 = arith.mulf %6, %17 : vector<8x1xf32>
    %19 = arith.subf %2, %18 : vector<8x1xf32>
    %20 = vector.broadcast %17 : vector<8x1xf32> to vector<8x512xf32>
    %21 = arith.mulf %0, %20 : vector<8x512xf32>
    %22 = vector.broadcast %19 : vector<8x1xf32> to vector<8x512xf32>
    %23 = arith.addf %21, %22 : vector<8x512xf32>
    %cst_9 = arith.constant 0.000000e+00 : f32
    %24 = vector.broadcast %cst_9 : f32 to vector<8x512xf32>
    %25 = arith.maximumf %23, %24 : vector<8x512xf32>
    %c0_10 = arith.constant 0 : index
    %c0_11 = arith.constant 0 : index
    %26 = vector.load %arg1[%c0_10, %c0_11] : memref<9x512xf32, #tpu.memory_space<vmem>>, vector<1x512xf32>
    %c34_i32 = arith.constant 34 : i32
    %27 = tpu.dynamic_rotate %25 by %c34_i32 dim 1 : vector<8x512xf32>, i32 -> vector<8x512xf32>
    %28 = vector.broadcast %26 : vector<1x512xf32> to vector<8x512xf32>
    %29 = arith.mulf %27, %28 : vector<8x512xf32>
    %c0_12 = arith.constant 0 : index
    %c0_13 = arith.constant 0 : index
    %30 = vector.load %arg9[%c0_12, %c0_13] : memref<72x512xf32, #tpu.memory_space<vmem>>, vector<8x512xf32>
    tpu.vector_store %arg9[%c0_12, %c0_13], %29 {strides = array<i32>} : memref<72x512xf32, #tpu.memory_space<vmem>>, vector<8x512xf32>,
    %c1 = arith.constant 1 : index
    %c0_14 = arith.constant 0 : index
    %31 = vector.load %arg1[%c1, %c0_14] : memref<9x512xf32, #tpu.memory_space<vmem>>, vector<1x512xf32>
    %c32_i32 = arith.constant 32 : i32
    %32 = tpu.dynamic_rotate %25 by %c32_i32 dim 1 : vector<8x512xf32>, i32 -> vector<8x512xf32>
    %33 = vector.broadcast %31 : vector<1x512xf32> to vector<8x512xf32>
    %34 = arith.mulf %32, %33 : vector<8x512xf32>
    %c8 = arith.constant 8 : index
    %c0_15 = arith.constant 0 : index
    %35 = vector.load %arg9[%c8, %c0_15] : memref<72x512xf32, #tpu.memory_space<vmem>>, vector<8x512xf32>
    tpu.vector_store %arg9[%c8, %c0_15], %34 {strides = array<i32>} : memref<72x512xf32, #tpu.memory_space<vmem>>, vector<8x512xf32>,
    %c2 = arith.constant 2 : index
    %c0_16 = arith.constant 0 : index
    %36 = vector.load %arg1[%c2, %c0_16] : memref<9x512xf32, #tpu.memory_space<vmem>>, vector<1x512xf32>
    %c30_i32 = arith.constant 30 : i32
    %37 = tpu.dynamic_rotate %25 by %c30_i32 dim 1 : vector<8x512xf32>, i32 -> vector<8x512xf32>
    %38 = vector.broadcast %36 : vector<1x512xf32> to vector<8x512xf32>
    %39 = arith.mulf %37, %38 : vector<8x512xf32>
    %c16 = arith.constant 16 : index
    %c0_17 = arith.constant 0 : index
    %40 = vector.load %arg9[%c16, %c0_17] : memref<72x512xf32, #tpu.memory_space<vmem>>, vector<8x512xf32>
    tpu.vector_store %arg9[%c16, %c0_17], %39 {strides = array<i32>} : memref<72x512xf32, #tpu.memory_space<vmem>>, vector<8x512xf32>,
    %c3 = arith.constant 3 : index
    %c0_18 = arith.constant 0 : index
    %41 = vector.load %arg1[%c3, %c0_18] : memref<9x512xf32, #tpu.memory_space<vmem>>, vector<1x512xf32>
    %c2_i32 = arith.constant 2 : i32
    %42 = tpu.dynamic_rotate %25 by %c2_i32 dim 1 : vector<8x512xf32>, i32 -> vector<8x512xf32>
    %43 = vector.broadcast %41 : vector<1x512xf32> to vector<8x512xf32>
    %44 = arith.mulf %42, %43 : vector<8x512xf32>
    %c24 = arith.constant 24 : index
    %c0_19 = arith.constant 0 : index
    %45 = vector.load %arg9[%c24, %c0_19] : memref<72x512xf32, #tpu.memory_space<vmem>>, vector<8x512xf32>
    tpu.vector_store %arg9[%c24, %c0_19], %44 {strides = array<i32>} : memref<72x512xf32, #tpu.memory_space<vmem>>, vector<8x512xf32>,
    %c32 = arith.constant 32 : index
    %c0_20 = arith.constant 0 : index
    %46 = vector.load %arg9[%c32, %c0_20] : memref<72x512xf32, #tpu.memory_space<vmem>>, vector<8x512xf32>
    tpu.vector_store %arg9[%c32, %c0_20], %25 {strides = array<i32>} : memref<72x512xf32, #tpu.memory_space<vmem>>, vector<8x512xf32>,
    %c5 = arith.constant 5 : index
    %c0_21 = arith.constant 0 : index
    %47 = vector.load %arg1[%c5, %c0_21] : memref<9x512xf32, #tpu.memory_space<vmem>>, vector<1x512xf32>
    %c510_i32 = arith.constant 510 : i32
    %48 = tpu.dynamic_rotate %25 by %c510_i32 dim 1 : vector<8x512xf32>, i32 -> vector<8x512xf32>
    %49 = vector.broadcast %47 : vector<1x512xf32> to vector<8x512xf32>
    %50 = arith.mulf %48, %49 : vector<8x512xf32>
    %c40 = arith.constant 40 : index
    %c0_22 = arith.constant 0 : index
    %51 = vector.load %arg9[%c40, %c0_22] : memref<72x512xf32, #tpu.memory_space<vmem>>, vector<8x512xf32>
    tpu.vector_store %arg9[%c40, %c0_22], %50 {strides = array<i32>} : memref<72x512xf32, #tpu.memory_space<vmem>>, vector<8x512xf32>,
    %c6 = arith.constant 6 : index
    %c0_23 = arith.constant 0 : index
    %52 = vector.load %arg1[%c6, %c0_23] : memref<9x512xf32, #tpu.memory_space<vmem>>, vector<1x512xf32>
    %c482_i32 = arith.constant 482 : i32
    %53 = tpu.dynamic_rotate %25 by %c482_i32 dim 1 : vector<8x512xf32>, i32 -> vector<8x512xf32>
    %54 = vector.broadcast %52 : vector<1x512xf32> to vector<8x512xf32>
    %55 = arith.mulf %53, %54 : vector<8x512xf32>
    %c48 = arith.constant 48 : index
    %c0_24 = arith.constant 0 : index
    %56 = vector.load %arg9[%c48, %c0_24] : memref<72x512xf32, #tpu.memory_space<vmem>>, vector<8x512xf32>
    tpu.vector_store %arg9[%c48, %c0_24], %55 {strides = array<i32>} : memref<72x512xf32, #tpu.memory_space<vmem>>, vector<8x512xf32>,
    %c7 = arith.constant 7 : index
    %c0_25 = arith.constant 0 : index
    %57 = vector.load %arg1[%c7, %c0_25] : memref<9x512xf32, #tpu.memory_space<vmem>>, vector<1x512xf32>
    %c480_i32 = arith.constant 480 : i32
    %58 = tpu.dynamic_rotate %25 by %c480_i32 dim 1 : vector<8x512xf32>, i32 -> vector<8x512xf32>
    %59 = vector.broadcast %57 : vector<1x512xf32> to vector<8x512xf32>
    %60 = arith.mulf %58, %59 : vector<8x512xf32>
    %c56 = arith.constant 56 : index
    %c0_26 = arith.constant 0 : index
    %61 = vector.load %arg9[%c56, %c0_26] : memref<72x512xf32, #tpu.memory_space<vmem>>, vector<8x512xf32>
    tpu.vector_store %arg9[%c56, %c0_26], %60 {strides = array<i32>} : memref<72x512xf32, #tpu.memory_space<vmem>>, vector<8x512xf32>,
    %c8_27 = arith.constant 8 : index
    %c0_28 = arith.constant 0 : index
    %62 = vector.load %arg1[%c8_27, %c0_28] : memref<9x512xf32, #tpu.memory_space<vmem>>, vector<1x512xf32>
    %c478_i32 = arith.constant 478 : i32
    %63 = tpu.dynamic_rotate %25 by %c478_i32 dim 1 : vector<8x512xf32>, i32 -> vector<8x512xf32>
    %64 = vector.broadcast %62 : vector<1x512xf32> to vector<8x512xf32>
    %65 = arith.mulf %63, %64 : vector<8x512xf32>
    %c64 = arith.constant 64 : index
    %c0_29 = arith.constant 0 : index
    %66 = vector.load %arg9[%c64, %c0_29] : memref<72x512xf32, #tpu.memory_space<vmem>>, vector<8x512xf32>
    tpu.vector_store %arg9[%c64, %c0_29], %65 {strides = array<i32>} : memref<72x512xf32, #tpu.memory_space<vmem>>, vector<8x512xf32>,
    %c0_30 = arith.constant 0 : index
    %c0_31 = arith.constant 0 : index
    %67 = vector.load %arg4[%c0_30, %c0_31] : memref<8x72xbf16, #tpu.memory_space<vmem>>, vector<8x72xbf16>
    %c0_32 = arith.constant 0 : index
    %c0_33 = arith.constant 0 : index
    %68 = vector.load %arg9[%c0_32, %c0_33] : memref<72x512xf32, #tpu.memory_space<vmem>>, vector<72x512xf32>
    %69 = arith.truncf %68 : vector<72x512xf32> to vector<72x512xbf16>
    %cst_34 = arith.constant dense<0.000000e+00> : vector<8x512xf32>
    %70 = tpu.matmul %67, %69, %cst_34 {dimension_numbers = #tpu.dot_dimension_numbers<[1], [0], [0], [1], [0, 0, 1, 1], [], []>} : vector<8x72xbf16>, vector<72x512xbf16>, vector<8x512xf32> -> vector<8x512xf32>
    %c0_35 = arith.constant 0 : index
    %c0_36 = arith.constant 0 : index
    %71 = vector.load %arg5[%c0_35, %c0_36] : memref<8x1xf32, #tpu.memory_space<vmem>>, vector<8x1xf32>
    %c0_37 = arith.constant 0 : index
    %c0_38 = arith.constant 0 : index
    %72 = vector.load %arg6[%c0_37, %c0_38] : memref<8x1xf32, #tpu.memory_space<vmem>>, vector<8x1xf32>
    %cst_39 = arith.constant dense<0.000000e+00> : vector<8xf32>
    %73 = vector.multi_reduction <add>, %70, %cst_39 [1] : vector<8x512xf32> to vector<8xf32>
    %74 = vector.shape_cast %73 : vector<8xf32> to vector<8x1xf32>
    %cst_40 = arith.constant 0.001953125 : f32
    %75 = vector.broadcast %cst_40 : f32 to vector<8x1xf32>
    %76 = arith.mulf %74, %75 : vector<8x1xf32>
    %77 = arith.mulf %70, %70 : vector<8x512xf32>
    %cst_41 = arith.constant dense<0.000000e+00> : vector<8xf32>
    %78 = vector.multi_reduction <add>, %77, %cst_41 [1] : vector<8x512xf32> to vector<8xf32>
    %79 = vector.shape_cast %78 : vector<8xf32> to vector<8x1xf32>
    %cst_42 = arith.constant 0.001953125 : f32
    %80 = vector.broadcast %cst_42 : f32 to vector<8x1xf32>
    %81 = arith.mulf %79, %80 : vector<8x1xf32>
    %82 = arith.mulf %76, %76 : vector<8x1xf32>
    %83 = arith.subf %81, %82 : vector<8x1xf32>
    %cst_43 = arith.constant 9.99999974E-6 : f32
    %84 = vector.broadcast %cst_43 : f32 to vector<8x1xf32>
    %85 = arith.addf %83, %84 : vector<8x1xf32>
    %86 = math.rsqrt %85 : vector<8x1xf32>
    %87 = arith.mulf %71, %86 : vector<8x1xf32>
    %88 = arith.mulf %76, %87 : vector<8x1xf32>
    %89 = arith.subf %72, %88 : vector<8x1xf32>
    %90 = vector.broadcast %87 : vector<8x1xf32> to vector<8x512xf32>
    %91 = arith.mulf %70, %90 : vector<8x512xf32>
    %92 = vector.broadcast %89 : vector<8x1xf32> to vector<8x512xf32>
    %93 = arith.addf %91, %92 : vector<8x512xf32>
    %cst_44 = arith.constant 0.000000e+00 : f32
    %94 = vector.broadcast %cst_44 : f32 to vector<8x512xf32>
    %95 = arith.maximumf %93, %94 : vector<8x512xf32>
    %c0_45 = arith.constant 0 : index
    %c0_46 = arith.constant 0 : index
    %96 = vector.load %arg1[%c0_45, %c0_46] : memref<9x512xf32, #tpu.memory_space<vmem>>, vector<1x512xf32>
    %c34_i32_47 = arith.constant 34 : i32
    %97 = tpu.dynamic_rotate %95 by %c34_i32_47 dim 1 : vector<8x512xf32>, i32 -> vector<8x512xf32>
    %98 = vector.broadcast %96 : vector<1x512xf32> to vector<8x512xf32>
    %99 = arith.mulf %97, %98 : vector<8x512xf32>
    %c0_48 = arith.constant 0 : index
    %c0_49 = arith.constant 0 : index
    %100 = vector.load %arg9[%c0_48, %c0_49] : memref<72x512xf32, #tpu.memory_space<vmem>>, vector<8x512xf32>
    tpu.vector_store %arg9[%c0_48, %c0_49], %99 {strides = array<i32>} : memref<72x512xf32, #tpu.memory_space<vmem>>, vector<8x512xf32>,
    %c1_50 = arith.constant 1 : index
    %c0_51 = arith.constant 0 : index
    %101 = vector.load %arg1[%c1_50, %c0_51] : memref<9x512xf32, #tpu.memory_space<vmem>>, vector<1x512xf32>
    %c32_i32_52 = arith.constant 32 : i32
    %102 = tpu.dynamic_rotate %95 by %c32_i32_52 dim 1 : vector<8x512xf32>, i32 -> vector<8x512xf32>
    %103 = vector.broadcast %101 : vector<1x512xf32> to vector<8x512xf32>
    %104 = arith.mulf %102, %103 : vector<8x512xf32>
    %c8_53 = arith.constant 8 : index
    %c0_54 = arith.constant 0 : index
    %105 = vector.load %arg9[%c8_53, %c0_54] : memref<72x512xf32, #tpu.memory_space<vmem>>, vector<8x512xf32>
    tpu.vector_store %arg9[%c8_53, %c0_54], %104 {strides = array<i32>} : memref<72x512xf32, #tpu.memory_space<vmem>>, vector<8x512xf32>,
    %c2_55 = arith.constant 2 : index
    %c0_56 = arith.constant 0 : index
    %106 = vector.load %arg1[%c2_55, %c0_56] : memref<9x512xf32, #tpu.memory_space<vmem>>, vector<1x512xf32>
    %c30_i32_57 = arith.constant 30 : i32
    %107 = tpu.dynamic_rotate %95 by %c30_i32_57 dim 1 : vector<8x512xf32>, i32 -> vector<8x512xf32>
    %108 = vector.broadcast %106 : vector<1x512xf32> to vector<8x512xf32>
    %109 = arith.mulf %107, %108 : vector<8x512xf32>
    %c16_58 = arith.constant 16 : index
    %c0_59 = arith.constant 0 : index
    %110 = vector.load %arg9[%c16_58, %c0_59] : memref<72x512xf32, #tpu.memory_space<vmem>>, vector<8x512xf32>
    tpu.vector_store %arg9[%c16_58, %c0_59], %109 {strides = array<i32>} : memref<72x512xf32, #tpu.memory_space<vmem>>, vector<8x512xf32>,
    %c3_60 = arith.constant 3 : index
    %c0_61 = arith.constant 0 : index
    %111 = vector.load %arg1[%c3_60, %c0_61] : memref<9x512xf32, #tpu.memory_space<vmem>>, vector<1x512xf32>
    %c2_i32_62 = arith.constant 2 : i32
    %112 = tpu.dynamic_rotate %95 by %c2_i32_62 dim 1 : vector<8x512xf32>, i32 -> vector<8x512xf32>
    %113 = vector.broadcast %111 : vector<1x512xf32> to vector<8x512xf32>
    %114 = arith.mulf %112, %113 : vector<8x512xf32>
    %c24_63 = arith.constant 24 : index
    %c0_64 = arith.constant 0 : index
    %115 = vector.load %arg9[%c24_63, %c0_64] : memref<72x512xf32, #tpu.memory_space<vmem>>, vector<8x512xf32>
    tpu.vector_store %arg9[%c24_63, %c0_64], %114 {strides = array<i32>} : memref<72x512xf32, #tpu.memory_space<vmem>>, vector<8x512xf32>,
    %c32_65 = arith.constant 32 : index
    %c0_66 = arith.constant 0 : index
    %116 = vector.load %arg9[%c32_65, %c0_66] : memref<72x512xf32, #tpu.memory_space<vmem>>, vector<8x512xf32>
    tpu.vector_store %arg9[%c32_65, %c0_66], %95 {strides = array<i32>} : memref<72x512xf32, #tpu.memory_space<vmem>>, vector<8x512xf32>,
    %c5_67 = arith.constant 5 : index
    %c0_68 = arith.constant 0 : index
    %117 = vector.load %arg1[%c5_67, %c0_68] : memref<9x512xf32, #tpu.memory_space<vmem>>, vector<1x512xf32>
    %c510_i32_69 = arith.constant 510 : i32
    %118 = tpu.dynamic_rotate %95 by %c510_i32_69 dim 1 : vector<8x512xf32>, i32 -> vector<8x512xf32>
    %119 = vector.broadcast %117 : vector<1x512xf32> to vector<8x512xf32>
    %120 = arith.mulf %118, %119 : vector<8x512xf32>
    %c40_70 = arith.constant 40 : index
    %c0_71 = arith.constant 0 : index
    %121 = vector.load %arg9[%c40_70, %c0_71] : memref<72x512xf32, #tpu.memory_space<vmem>>, vector<8x512xf32>
    tpu.vector_store %arg9[%c40_70, %c0_71], %120 {strides = array<i32>} : memref<72x512xf32, #tpu.memory_space<vmem>>, vector<8x512xf32>,
    %c6_72 = arith.constant 6 : index
    %c0_73 = arith.constant 0 : index
    %122 = vector.load %arg1[%c6_72, %c0_73] : memref<9x512xf32, #tpu.memory_space<vmem>>, vector<1x512xf32>
    %c482_i32_74 = arith.constant 482 : i32
    %123 = tpu.dynamic_rotate %95 by %c482_i32_74 dim 1 : vector<8x512xf32>, i32 -> vector<8x512xf32>
    %124 = vector.broadcast %122 : vector<1x512xf32> to vector<8x512xf32>
    %125 = arith.mulf %123, %124 : vector<8x512xf32>
    %c48_75 = arith.constant 48 : index
    %c0_76 = arith.constant 0 : index
    %126 = vector.load %arg9[%c48_75, %c0_76] : memref<72x512xf32, #tpu.memory_space<vmem>>, vector<8x512xf32>
    tpu.vector_store %arg9[%c48_75, %c0_76], %125 {strides = array<i32>} : memref<72x512xf32, #tpu.memory_space<vmem>>, vector<8x512xf32>,
    %c7_77 = arith.constant 7 : index
    %c0_78 = arith.constant 0 : index
    %127 = vector.load %arg1[%c7_77, %c0_78] : memref<9x512xf32, #tpu.memory_space<vmem>>, vector<1x512xf32>
    %c480_i32_79 = arith.constant 480 : i32
    %128 = tpu.dynamic_rotate %95 by %c480_i32_79 dim 1 : vector<8x512xf32>, i32 -> vector<8x512xf32>
    %129 = vector.broadcast %127 : vector<1x512xf32> to vector<8x512xf32>
    %130 = arith.mulf %128, %129 : vector<8x512xf32>
    %c56_80 = arith.constant 56 : index
    %c0_81 = arith.constant 0 : index
    %131 = vector.load %arg9[%c56_80, %c0_81] : memref<72x512xf32, #tpu.memory_space<vmem>>, vector<8x512xf32>
    tpu.vector_store %arg9[%c56_80, %c0_81], %130 {strides = array<i32>} : memref<72x512xf32, #tpu.memory_space<vmem>>, vector<8x512xf32>,
    %c8_82 = arith.constant 8 : index
    %c0_83 = arith.constant 0 : index
    %132 = vector.load %arg1[%c8_82, %c0_83] : memref<9x512xf32, #tpu.memory_space<vmem>>, vector<1x512xf32>
    %c478_i32_84 = arith.constant 478 : i32
    %133 = tpu.dynamic_rotate %95 by %c478_i32_84 dim 1 : vector<8x512xf32>, i32 -> vector<8x512xf32>
    %134 = vector.broadcast %132 : vector<1x512xf32> to vector<8x512xf32>
    %135 = arith.mulf %133, %134 : vector<8x512xf32>
    %c64_85 = arith.constant 64 : index
    %c0_86 = arith.constant 0 : index
    %136 = vector.load %arg9[%c64_85, %c0_86] : memref<72x512xf32, #tpu.memory_space<vmem>>, vector<8x512xf32>
    tpu.vector_store %arg9[%c64_85, %c0_86], %135 {strides = array<i32>} : memref<72x512xf32, #tpu.memory_space<vmem>>, vector<8x512xf32>,
    %c0_87 = arith.constant 0 : index
    %c0_88 = arith.constant 0 : index
    %137 = vector.load %arg7[%c0_87, %c0_88] : memref<8x72xbf16, #tpu.memory_space<vmem>>, vector<8x72xbf16>
    %c0_89 = arith.constant 0 : index
    %c0_90 = arith.constant 0 : index
    %138 = vector.load %arg9[%c0_89, %c0_90] : memref<72x512xf32, #tpu.memory_space<vmem>>, vector<72x512xf32>
    %139 = arith.truncf %138 : vector<72x512xf32> to vector<72x512xbf16>
    %cst_91 = arith.constant dense<0.000000e+00> : vector<8x512xf32>
    %140 = tpu.matmul %137, %139, %cst_91 {dimension_numbers = #tpu.dot_dimension_numbers<[1], [0], [0], [1], [0, 0, 1, 1], [], []>} : vector<8x72xbf16>, vector<72x512xbf16>, vector<8x512xf32> -> vector<8x512xf32>
    %141 = arith.addf %140, %0 : vector<8x512xf32>
    %c0_92 = arith.constant 0 : index
    %c0_93 = arith.constant 0 : index
    %142 = vector.load %arg8[%c0_92, %c0_93] : memref<8x512xf32, #tpu.memory_space<vmem>>, vector<8x512xf32>
    tpu.vector_store %arg8[%c0_92, %c0_93], %141 {strides = array<i32>} : memref<8x512xf32, #tpu.memory_space<vmem>>, vector<8x512xf32>,
    return
  }
}

</mosaic_0001>

<bundles_post_ra>
// kernel: tpu_custom_call.1
= control target key start
LH: loop header
LB: loop body
LE: loop exit
PB: predicated region body
PF: predicated region fallthrough
CT: control target
= control target key end

     0   :  { %13 = vsyncpa [#allocation4], 0  ;;  %s1783_s0 = inlined_call_operand.vmem [shape: f32[8,512], index: 0, kind: input, shape index: {}]   ;;  %s1784_s1 = inlined_call_operand.hbm [shape: f32[9,512], index: 1, kind: input, shape index: {}]   ;;  %s1785_s2 = inlined_call_operand.vmem [shape: f32[8,1], index: 2, kind: input, shape index: {}]   ;;  %s1786_s3 = inlined_call_operand.vmem [shape: f32[8,1], index: 3, kind: input, shape index: {}]   ;;  %s1787_s4 = inlined_call_operand.vmem [shape: bf16[8,72], index: 4, kind: input, shape index: {}]   ;;  %s1788_s5 = inlined_call_operand.vmem [shape: f32[8,1], index: 5, kind: input, shape index: {}]   ;;  %s1789_s6 = inlined_call_operand.vmem [shape: f32[8,1], index: 6, kind: input, shape index: {}]   ;;  %s1790_s7 = inlined_call_operand.vmem [shape: bf16[8,72], index: 7, kind: input, shape index: {}]   ;;  %s1791_s8 = inlined_call_operand.hbm [shape: f32[8,512], index: 8, kind: output, shape index: {}]  }
   0x1   :  { %14 = vsyncpa [#allocation5], 0  ;;  %s1247_s27 = smov [#allocation3]   ;;  %s1199_s9 = scalar_lea.hbm %s1784_s1, 1024 }
   0x2   :  { %s22_s28 = sshll.u32 %s1247_s27, 4  ;;  %p1200_p0 = scmp.ne.s32.totalorder %s1784_s1, %s1199_s9  ;;  %s23_s28 = int_to_ptr.vmem [resolvable:$true] %s22_s28 }
   0x3   :  { %p1203_p1 = scmp.lt.u32.totalorder %s1199_s9, %s1784_s1 }
   0x5   :  { %p1205_p2 = pnand %p1203_p1, %p1200_p0 }
   0x7   :  { %1208 = shalt.err (!%p1205_p2)
}
   0x8   :  { %s1209_s14 = scalar_lea.vmem %s23_s28, 1024  ;;  %p1214_p4 = scmp.lt.s32.totalorder %s23_s28, %s23_s28 }
   0x9   :  { %p1210_p3 = scmp.ne.s32.totalorder %s23_s28, %s1209_s14  ;;  %p1215_p5 = scmp.lt.s32.totalorder %s1209_s14, %s1209_s14 }
   0xb   :  { %p1216_p6 = por %p1215_p5, %p1214_p4 }
   0xd   :  { %p1217_p7 = pnand %p1216_p6, %p1210_p3 }
   0xf   :  { %1220 = shalt.err (!%p1217_p7)
}
  0x10   :  { %s1248_s15 = smov 512   ;;  %s1249_s16 = smov 32  }
  0x11   :  { %28 = dma.hbm_to_vmem [thread:$0]  %s1784_s1, 1024, %s23_s28, [#allocation4], %s1248_s15, %s1248_s15, %s1249_s16  }
  0x12   :  { %1243 = dma.done.wait [#allocation4], 1024  }
  0x13   :  { %1244 = vsyncadd [#allocation4], 4294966272  ;;  %v45_v0 = vld [vmem:[%s1783_s0] sm:$0xff]  ;;  %v46_v1 = vld [vmem:[%s1783_s0 + $0x8] sm:$0xff]  ;;  %v1250_v14 = vmov 0   ;;  %s1253_s30 = smov 2   ;;  %v105_v42 = vlaneseq }
  0x14   :  { %v47_v2 = vld [vmem:[%s1783_s0 + $0x10] sm:$0xff]  ;;  %v51_v3 = vadd.f32 %v46_v1, %v45_v0  ;;  %v57_v4 = vmul.f32 %v45_v0, %v45_v0  ;;  %v58_v5 = vmul.f32 %v46_v1, %v46_v1  ;;  %v48_v7 = vld [vmem:[%s1783_s0 + $0x18] sm:$0xff]  ;;  %1189 = vset.pattern.permute.xlu1 %v1250_v14  ;;  %559 = vmatprep.mubr.bf16.mxu0 %v1250_v14  ;;  %v49_v22 = vld [vmem:[%s1785_s2] sm:$0xff]  ;;  %s1251_s2 = smov 34   ;;  %s1254_s9 = smov 126   ;;  %vm514_vm8 = vcmask 1043456  }
  0x15   :  { %v59_v6 = vmul.f32 %v47_v2, %v47_v2  ;;  %v60_v9 = vmul.f32 %v48_v7, %v48_v7  ;;  %600 = vmatprep.mubr.bf16.mxu1 %v1250_v14  ;;  %1190 = vset.pattern.permute.xlu0 %v1250_v14  ;;  %v50_v25 = vld [vmem:[%s1786_s3] sm:$0xff]  ;;  %s1252_s3 = smov 30   ;;  %s1255_s10 = smov 98   ;;  %v114_v43 = vshrl.u32 %v105_v42, 7  ;;  %v1411_v45 = vand.u32 127, %v105_v42 }
  0x16   :  { %v52_v8 = vadd.f32 %v51_v3, %v47_v2  ;;  %v61_v10 = vadd.f32 %v58_v5, %v57_v4  ;;  %s1256_s11 = smov 96   ;;  %s1257_s12 = smov 94   ;;  %v142_v48 = vld [vmem:[#allocation3 + $0x1] ss:$8 sm:$0xf]  ;;  %vm510_vm9 = vcmask 588800  }
  0x17   :  { %v1413_v47 = vsub.s32 1, %v114_v43  ;;  %v96_v49 = vld [vmem:[#allocation3] ss:$8 sm:$0xf]  ;;  %vm107_vm0 = vcmp.lt.s32.totalorder %v1411_v45, 34  ;;  %vm151_vm1 = vcmp.lt.s32.totalorder %v1411_v45, 32 }
  0x18   :  { %v53_v11 = vadd.f32 %v52_v8, %v48_v7  ;;  %v62_v12 = vadd.f32 %v61_v10, %v59_v6  ;;  %v1425_v58 = vsub.s32 0, %v114_v43  ;;  %vm195_vm2 = vcmp.lt.s32.totalorder %v1411_v45, 30  ;;  %s1258_s21 = smov [#allocation6]  }
  0x19   :  { %v120_v52 = vrot.slane %v96_v49, %v1413_v47  ;;  %v164_v53 = vrot.slane %v142_v48, %v1413_v47  ;;  %vm239_vm3 = vcmp.lt.s32.totalorder %v1411_v45, 2  ;;  %vm287_vm4 = vcmp.lt.s32.totalorder %v1411_v45, 126  ;;  %s1160_s22 = sshll.u32 %s1258_s21, 4  ;;  %s1161_s22 = int_to_ptr.vmem [resolvable:$true] %s1160_s22 }
  0x1a   :  { %54 = vadd.xlane.f32.xlu0 %v53_v11  ;;  %v63_v13 = vadd.f32 %v62_v12, %v60_v9  ;;  %v160_v3 = vrot.slane %v142_v48, %v1425_v58  ;;  %vm331_vm5 = vcmp.lt.s32.totalorder %v1411_v45, 98  ;;  %vm375_vm6 = vcmp.lt.s32.totalorder %v1411_v45, 96  ;;  %s1221_s26 = scalar_lea.vmem %s1161_s22, 512  ;;  %p1226_p9 = scmp.lt.s32.totalorder %s1161_s22, %s1161_s22 }
  0x1b   :  { %vm419_vm7 = vcmp.lt.s32.totalorder %v1411_v45, 94  ;;  %p1222_p8 = scmp.ne.s32.totalorder %s1161_s22, %s1221_s26  ;;  %p1227_p10 = scmp.lt.s32.totalorder %s1221_s26, %s1221_s26 }
  0x1d   :  { %p1228_p11 = por %p1227_p10, %p1226_p9 }
  0x1e   :  { %64 = vadd.xlane.f32.xlu0 %v63_v13 }
  0x1f   :  { %p1229_p12 = pnand %p1228_p11, %p1222_p8 }
  0xa7   :  { %v55_v15 = vpop.xlane.xlu0 %54 }
  0xa8   :  { %v56_v16 = vmul.f32 0.001953125, %v55_v15 }
  0xaa   :  { %v67_v18 = vmul.f32 %v56_v16, %v56_v16 }
  0xab   :  { %v65_v17 = vpop.xlane.xlu0 %64 }
  0xac   :  { %v66_v19 = vmul.f32 0.001953125, %v65_v17 }
  0xae   :  { %v68_v20 = vsub.f32 %v66_v19, %v67_v18 }
  0xb0   :  { %v69_v21 = vadd.f32 1e-05, %v68_v20 }
  0xb2   :  { %1191 = vrsqrt.f32 %v69_v21 }
  0xbc   :  { %v1192_v23 = vpop.eup %1191 }
  0xbd   :  { %v71_v24 = vmul.f32 %v1192_v23, %v49_v22 }
  0xbf   :  { %76 = vperm.xlu1 %1189, %v71_v24   ;;  %v72_v26 = vmul.f32 %v71_v24, %v56_v16 }
  0xc1   :  { %v73_v27 = vsub.f32 %v50_v25, %v72_v26  ;;  %v186_v26 = vld [vmem:[#allocation3 + $0x2] ss:$8 sm:$0xf] }
  0xc3   :  { %85 = vperm.xlu1 %1189, %v73_v27  }
 0x13e   :  { %v77_v28 = vpop.permute.xlu1 %76 }
 0x13f   :  { %v79_v29 = vmul.f32 %v77_v28, %v45_v0  ;;  %v80_v30 = vmul.f32 %v77_v28, %v46_v1  ;;  %v81_v32 = vmul.f32 %v77_v28, %v47_v2  ;;  %v82_v39 = vmul.f32 %v77_v28, %v48_v7 }
 0x140   :  { %v1429_v0 = vsub.s32 2, %v114_v43  ;;  %v1431_v1 = vsub.s32 3, %v114_v43  ;;  %v116_v2 = vrot.slane %v96_v49, %v1425_v58 }
 0x142   :  { %v86_v31 = vpop.permute.xlu1 %85  ;;  %v168_v7 = vrot.slane %v142_v48, %v1429_v0  ;;  %v172_v9 = vrot.slane %v142_v48, %v1431_v1  ;;  %v124_v12 = vrot.slane %v96_v49, %v1429_v0  ;;  %v128_v13 = vrot.slane %v96_v49, %v1431_v1 }
 0x143   :  { %v88_v33 = vadd.f32 %v86_v31, %v79_v29  ;;  %v89_v34 = vadd.f32 %v86_v31, %v80_v30  ;;  %v90_v35 = vadd.f32 %v86_v31, %v81_v32  ;;  %v91_v40 = vadd.f32 %v86_v31, %v82_v39  ;;  %v230_v31 = vld [vmem:[#allocation3 + $0x3] ss:$8 sm:$0xf] }
 0x144   :  { %v208_v32 = vrot.slane %v186_v26, %v1413_v47  ;;  %v248_v43 = vrot.slane %v230_v31, %v1425_v58 }
 0x145   :  { %v1339_v36 = vmax.f32 %v88_v33, 0.0  ;;  %v1341_v37 = vmax.f32 %v89_v34, 0.0  ;;  %v1347_v38 = vmax.f32 %v90_v35, 0.0  ;;  %v1357_v41 = vmax.f32 %v91_v40, 0.0 }
 0x146   :  { %v252_v33 = vrot.slane %v230_v31, %v1413_v47 }
 0x147   :  { %99 = vrot.lane.b32.xlu1 %v1341_v37, %s1251_s2  ;;  %97 = vrot.lane.b32.xlu0 %v1339_v36, %s1251_s2 }
 0x14b   :  { %143 = vrot.lane.b32.xlu1 %v1339_v36, %s1249_s16  ;;  %147 = vrot.lane.b32.xlu0 %v1347_v38, %s1249_s16 }
 0x14f   :  { %145 = vrot.lane.b32.xlu1 %v1341_v37, %s1249_s16  ;;  %189 = vrot.lane.b32.xlu0 %v1341_v37, %s1252_s3 }
 0x153   :  { %103 = vrot.lane.b32.xlu1 %v1357_v41, %s1251_s2  ;;  %233 = vrot.lane.b32.xlu0 %v1341_v37, %s1253_s30 }
 0x157   :  { %149 = vrot.lane.b32.xlu1 %v1357_v41, %s1249_s16  ;;  %237 = vrot.lane.b32.xlu0 %v1357_v41, %s1253_s30 }
 0x15b   :  { %101 = vrot.lane.b32.xlu1 %v1347_v38, %s1251_s2  ;;  %235 = vrot.lane.b32.xlu0 %v1347_v38, %s1253_s30 }
 0x15f   :  { %187 = vrot.lane.b32.xlu1 %v1339_v36, %s1252_s3  ;;  %283 = vrot.lane.b32.xlu0 %v1347_v38, %s1254_s9 }
 0x163   :  { %231 = vrot.lane.b32.xlu1 %v1339_v36, %s1253_s30  ;;  %285 = vrot.lane.b32.xlu0 %v1357_v41, %s1254_s9 }
 0x167   :  { %193 = vrot.lane.b32.xlu1 %v1357_v41, %s1252_s3  ;;  %327 = vrot.lane.b32.xlu0 %v1347_v38, %s1255_s10 }
 0x16b   :  { %191 = vrot.lane.b32.xlu1 %v1347_v38, %s1252_s3  ;;  %371 = vrot.lane.b32.xlu0 %v1347_v38, %s1256_s11 }
 0x16f   :  { %281 = vrot.lane.b32.xlu1 %v1341_v37, %s1254_s9  ;;  %367 = vrot.lane.b32.xlu0 %v1339_v36, %s1256_s11 }
 0x173   :  { %279 = vrot.lane.b32.xlu1 %v1339_v36, %s1254_s9  ;;  %373 = vrot.lane.b32.xlu0 %v1357_v41, %s1256_s11 }
 0x177   :  { %325 = vrot.lane.b32.xlu1 %v1341_v37, %s1255_s10  ;;  %413 = vrot.lane.b32.xlu0 %v1341_v37, %s1257_s12 }
 0x17b   :  { %369 = vrot.lane.b32.xlu1 %v1341_v37, %s1256_s11  ;;  %417 = vrot.lane.b32.xlu0 %v1357_v41, %s1257_s12 }
 0x17f   :  { %323 = vrot.lane.b32.xlu1 %v1339_v36, %s1255_s10 }
 0x183   :  { %329 = vrot.lane.b32.xlu1 %v1357_v41, %s1255_s10 }
 0x187   :  { %411 = vrot.lane.b32.xlu1 %v1339_v36, %s1257_s12 }
 0x18b   :  { %415 = vrot.lane.b32.xlu1 %v1347_v38, %s1257_s12 }
 0x1b9   :  { %v100_v44 = vpop.permute.xlu1 %99  ;;  %v98_v46 = vpop.permute.xlu0 %97 }
 0x1ba   :  { %v110_v54 = vsel %vm107_vm0, %v98_v46, %v100_v44 }
 0x1bb   :  { %v134_v59 = vmul.f32 %v120_v52, %v110_v54  ;;  %v260_v52 = vrot.slane %v230_v31, %v1431_v1 }
 0x1bd   :  { %v144_v50 = vpop.permute.xlu1 %143  ;;  %v148_v51 = vpop.permute.xlu0 %147 }
 0x1c1   :  { %v146_v55 = vpop.permute.xlu1 %145  ;;  %v1421_v56 = vpop.permute.xlu0 %189 }
 0x1c2   :  { %v154_v57 = vsel %vm151_vm1, %v144_v50, %v146_v55  ;;  %v153_v15 = vsel %vm151_vm1, %v146_v55, %v148_v51 }
 0x1c3   :  { %v178_v60 = vmul.f32 %v164_v53, %v154_v57  ;;  %v179_v22 = vmul.f32 %v168_v7, %v153_v15 }
 0x1c5   :  { %v104_v61 = vpop.permute.xlu1 %103  ;;  %v1427_v62 = vpop.permute.xlu0 %233  ;;  %v491_v63 = vpack.c.bf16 %v178_v60, %v134_v59  ;;  %v212_v59 = vrot.slane %v186_v26, %v1429_v0  ;;  %v216_v60 = vrot.slane %v186_v26, %v1431_v1 }
 0x1c6   :  { %v111_v4 = vsel %vm107_vm0, %v104_v61, %v98_v46  ;;  %v204_v46 = vrot.slane %v186_v26, %v1425_v58 }
 0x1c7   :  { %527 = vmatprep.subr.bf16.mxu0 %v491_v63  ;;  %v133_v10 = vmul.f32 %v116_v2, %v111_v4  ;;  %v278_v2 = vld [vmem:[#allocation3 + $0x5] ss:$8 sm:$0xf] }
 0x1c9   :  { %v150_v5 = vpop.permute.xlu1 %149  ;;  %v238_v6 = vpop.permute.xlu0 %237 }
 0x1ca   :  { %v155_v8 = vsel %vm151_vm1, %v150_v5, %v144_v50  ;;  %v152_v16 = vsel %vm151_vm1, %v148_v51, %v150_v5  ;;  %v256_v51 = vrot.slane %v230_v31, %v1429_v0 }
 0x1cb   :  { %v177_v11 = vmul.f32 %v160_v3, %v155_v8  ;;  %v180_v25 = vmul.f32 %v172_v9, %v152_v16  ;;  %v300_v8 = vrot.slane %v278_v2, %v1413_v47  ;;  %v304_v16 = vrot.slane %v278_v2, %v1429_v0 }
 0x1cd   :  { %v102_v17 = vpop.permute.xlu1 %101  ;;  %v236_v18 = vpop.permute.xlu0 %235  ;;  %v490_v19 = vpack.c.bf16 %v177_v11, %v133_v10 }
 0x1ce   :  { %v108_v20 = vsel %vm107_vm0, %v102_v17, %v104_v61  ;;  %v109_v21 = vsel %vm107_vm0, %v100_v44, %v102_v17  ;;  %v240_v61 = vsel %vm239_vm3, %v236_v18, %v238_v6  ;;  %v241_v63 = vsel %vm239_vm3, %v1427_v62, %v236_v18 }
 0x1cf   :  { %v135_v23 = vmul.f32 %v124_v12, %v109_v21  ;;  %528 = vmatpush1.bf16.msra.mxu0 %v490_v19  ;;  %v136_v24 = vmul.f32 %v128_v13, %v108_v20  ;;  %v267_v9 = vmul.f32 %v256_v51, %v241_v63  ;;  %v268_v10 = vmul.f32 %v260_v52, %v240_v61  ;;  %v410_v61 = vld [vmem:[#allocation3 + $0x20] ss:$8 sm:$0xf] }
 0x1d0   :  { %v296_v19 = vrot.slane %v278_v2, %v1425_v58  ;;  %v308_v20 = vrot.slane %v278_v2, %v1431_v1 }
 0x1d1   :  { %v188_v27 = vpop.permute.xlu1 %187  ;;  %v284_v28 = vpop.permute.xlu0 %283  ;;  %v493_v29 = vpack.c.bf16 %v180_v25, %v136_v24  ;;  %v492_v30 = vpack.c.bf16 %v179_v22, %v135_v23 }
 0x1d2   :  { %v198_v34 = vsel %vm195_vm2, %v188_v27, %v1421_v56 }
 0x1d3   :  { %568 = vmatprep.subr.bf16.mxu1 %v493_v29  ;;  %v222_v42 = vmul.f32 %v208_v32, %v198_v34  ;;  %v322_v29 = vld [vmem:[#allocation3 + $0x6] ss:$8 sm:$0xf] }
 0x1d4   :  { %569 = vmatpush1.bf16.msra.mxu1 %v492_v30  ;;  %v344_v34 = vrot.slane %v322_v29, %v1413_v47 }
 0x1d5   :  { %v232_v35 = vpop.permute.xlu1 %231  ;;  %v286_v39 = vpop.permute.xlu0 %285 }
 0x1d6   :  { %v242_v40 = vsel %vm239_vm3, %v232_v35, %v1427_v62  ;;  %v243_v48 = vsel %vm239_vm3, %v238_v6, %v232_v35 }
 0x1d7   :  { %v266_v44 = vmul.f32 %v252_v33, %v242_v40  ;;  %v265_v54 = vmul.f32 %v248_v43, %v243_v48 }
 0x1d9   :  { %v194_v49 = vpop.permute.xlu1 %193  ;;  %v495_v50 = vpack.c.bf16 %v266_v44, %v222_v42  ;;  %v1469_v57 = vpop.permute.xlu0 %327  ;;  %v340_v44 = vrot.slane %v322_v29, %v1425_v58 }
 0x1da   :  { %v199_v53 = vsel %vm195_vm2, %v194_v49, %v188_v27 }
 0x1db   :  { %v221_v55 = vmul.f32 %v204_v46, %v199_v53  ;;  %529 = vmatprep.subr.bf16.mxu0 %v495_v50 }
 0x1dd   :  { %v192_v3 = vpop.permute.xlu1 %191  ;;  %v494_v4 = vpack.c.bf16 %v265_v54, %v221_v55  ;;  %v372_v62 = vpop.permute.xlu0 %371 }
 0x1de   :  { %v196_v5 = vsel %vm195_vm2, %v192_v3, %v194_v49  ;;  %v197_v7 = vsel %vm195_vm2, %v1421_v56, %v192_v3  ;;  %v288_v56 = vsel %vm287_vm4, %v284_v28, %v286_v39 }
 0x1df   :  { %v223_v11 = vmul.f32 %v212_v59, %v197_v7  ;;  %v224_v6 = vmul.f32 %v216_v60, %v196_v5  ;;  %530 = vmatpush1.bf16.msra.mxu0 %v494_v4  ;;  %v315_v23 = vmul.f32 %v304_v16, %v288_v56  ;;  %v348_v59 = vrot.slane %v322_v29, %v1429_v0 }
 0x1e0   :  { %v352_v60 = vrot.slane %v322_v29, %v1431_v1 }
 0x1e1   :  { %v282_v12 = vpop.permute.xlu1 %281  ;;  %v497_v13 = vpack.c.bf16 %v268_v10, %v224_v6  ;;  %v496_v15 = vpack.c.bf16 %v267_v9, %v223_v11  ;;  %v368_v26 = vpop.permute.xlu0 %367  ;;  %v500_v33 = vpack.c.bf16 %v315_v23, %v1347_v38  ;;  %v440_v9 = vrot.slane %v410_v61, %v1431_v1 }
 0x1e2   :  { %v289_v17 = vsel %vm287_vm4, %v282_v12, %v284_v28 }
 0x1e3   :  { %v314_v18 = vmul.f32 %v300_v8, %v289_v17  ;;  %570 = vmatprep.subr.bf16.mxu1 %v497_v13  ;;  %v428_v8 = vrot.slane %v410_v61, %v1425_v58 }
 0x1e4   :  { %571 = vmatpush1.bf16.msra.mxu1 %v496_v15 }
 0x1e5   :  { %v280_v21 = vpop.permute.xlu1 %279  ;;  %v499_v22 = vpack.c.bf16 %v314_v18, %v1341_v37  ;;  %v366_v37 = vld [vmem:[#allocation3 + $0x7] ss:$8 sm:$0xf]  ;;  %v374_v40 = vpop.permute.xlu0 %373 }
 0x1e6   :  { %v290_v24 = vsel %vm287_vm4, %v280_v21, %v282_v12  ;;  %v291_v25 = vsel %vm287_vm4, %v286_v39, %v280_v21  ;;  %v388_v35 = vrot.slane %v366_v37, %v1413_v47  ;;  %v384_v38 = vrot.slane %v366_v37, %v1425_v58 }
 0x1e7   :  { %v313_v27 = vmul.f32 %v296_v19, %v290_v24  ;;  %v316_v28 = vmul.f32 %v308_v20, %v291_v25  ;;  %531 = vmatprep.subr.bf16.mxu0 %v499_v22  ;;  %v392_v50 = vrot.slane %v366_v37, %v1429_v0  ;;  %v396_v51 = vrot.slane %v366_v37, %v1431_v1 }
 0x1e8   :  { %v376_v63 = vsel %vm375_vm6, %v372_v62, %v374_v40  ;;  %v379_v2 = vsel %vm375_vm6, %v374_v40, %v368_v26  ;;  %v432_v19 = vrot.slane %v410_v61, %v1413_v47  ;;  %v436_v20 = vrot.slane %v410_v61, %v1429_v0 }
 0x1e9   :  { %v326_v30 = vpop.permute.xlu1 %325  ;;  %v498_v31 = vpack.c.bf16 %v313_v27, %v1339_v36  ;;  %v501_v32 = vpack.c.bf16 %v316_v28, %v1357_v41  ;;  %v414_v53 = vpop.permute.xlu0 %413  ;;  %v403_v10 = vmul.f32 %v392_v50, %v376_v63  ;;  %v404_v11 = vmul.f32 %v396_v51, %v379_v2  ;;  %v609_v63 = vld [vmem:[%s1788_s5] sm:$0xff] }
 0x1ea   :  { %v333_v39 = vsel %vm331_vm5, %v326_v30, %v1469_v57 }
 0x1eb   :  { %532 = vmatpush1.bf16.msra.mxu0 %v498_v31  ;;  %572 = vmatprep.subr.bf16.mxu1 %v501_v32  ;;  %v358_v42 = vmul.f32 %v344_v34, %v333_v39  ;;  %v453_v32 = vld [vmem:[%s1787_s4] sm:$0xf] }
 0x1ec   :  { %573 = vmatpush1.bf16.msra.mxu1 %v500_v33 }
 0x1ed   :  { %v370_v36 = vpop.permute.xlu1 %369  ;;  %v418_v12 = vpop.permute.xlu0 %417 }
 0x1ee   :  { %v377_v41 = vsel %vm375_vm6, %v370_v36, %v372_v62  ;;  %v378_v46 = vsel %vm375_vm6, %v368_v26, %v370_v36 }
 0x1ef   :  { %v402_v43 = vmul.f32 %v388_v35, %v377_v41  ;;  %v401_v54 = vmul.f32 %v384_v38, %v378_v46 }
 0x1f1   :  { %v324_v48 = vpop.permute.xlu1 %323  ;;  %v503_v49 = vpack.c.bf16 %v402_v43, %v358_v42 }
 0x1f2   :  { %v334_v52 = vsel %vm331_vm5, %v324_v48, %v326_v30 }
 0x1f3   :  { %v357_v55 = vmul.f32 %v340_v44, %v334_v52  ;;  %533 = vmatprep.subr.bf16.mxu0 %v503_v49 }
 0x1f5   :  { %v330_v3 = vpop.permute.xlu1 %329  ;;  %v502_v4 = vpack.c.bf16 %v401_v54, %v357_v55 }
 0x1f6   :  { %v332_v5 = vsel %vm331_vm5, %v1469_v57, %v330_v3  ;;  %v335_v7 = vsel %vm331_vm5, %v330_v3, %v324_v48 }
 0x1f7   :  { %v359_v6 = vmul.f32 %v348_v59, %v332_v5  ;;  %v360_v62 = vmul.f32 %v352_v60, %v335_v7  ;;  %534 = vmatpush1.bf16.msra.mxu0 %v502_v4  ;;  %v610_v4 = vld [vmem:[%s1789_s6] sm:$0xff] }
 0x1f9   :  { %v412_v13 = vpop.permute.xlu1 %411  ;;  %v505_v15 = vpack.c.bf16 %v404_v11, %v360_v62  ;;  %v504_v16 = vpack.c.bf16 %v403_v10, %v359_v6 }
 0x1fa   :  { %v422_v17 = vsel %vm419_vm7, %v412_v13, %v414_v53  ;;  %v423_v57 = vsel %vm419_vm7, %v418_v12, %v412_v13 }
 0x1fb   :  { %v445_v56 = vmul.f32 %v428_v8, %v422_v17  ;;  %v448_v18 = vmul.f32 %v440_v9, %v423_v57  ;;  %574 = vmatprep.subr.bf16.mxu1 %v505_v15 }
 0x1fc   :  { %575 = vmatpush1.bf16.msra.mxu1 %v504_v16 }
 0x1fd   :  { %v509_v21 = vpack.c.bf16 %v448_v18, %v448_v18  ;;  %v416_v22 = vpop.permute.xlu1 %415  ;;  %v506_v25 = vpack.c.bf16 %v445_v56, %v445_v56 }
 0x1fe   :  { %v420_v23 = vsel %vm419_vm7, %v416_v22, %v418_v12  ;;  %v421_v24 = vsel %vm419_vm7, %v414_v53, %v416_v22 }
 0x1ff   :  { %v446_v26 = vmul.f32 %v432_v19, %v421_v24  ;;  %v447_v27 = vmul.f32 %v436_v20, %v420_v23  ;;  %1171 = vmatprep.subr.msk.bf16.mxu1 %vm514_vm8, %v509_v21  ;;  %v516_v30 = vsel %vm514_vm8, %v506_v25, 0 }
 0x201   :  { %v507_v28 = vpack.c.bf16 %v446_v26, %v446_v26  ;;  %v508_v29 = vpack.c.bf16 %v447_v27, %v447_v27  ;;  %v656_v27 = vld [vmem:[#allocation3] ss:$8 sm:$0xf] }
 0x203   :  { %1169 = vmatprep.subr.msk.bf16.mxu0 %vm514_vm8, %v507_v28  ;;  %v522_v31 = vsel %vm514_vm8, %v508_v29, 0  ;;  %v698_v28 = vld [vmem:[#allocation3 + $0x1] ss:$8 sm:$0xf] }
 0x204   :  { %536 = vmatpush1.bf16.msra.mxu0 %v516_v30  ;;  %577 = vmatpush1.bf16.msra.mxu1 %v522_v31  ;;  %v677_v30 = vrot.slane %v656_v27, %v1413_v47  ;;  %v719_v31 = vrot.slane %v698_v28, %v1413_v47 }
 0x207   :  { %1170 = vmatmul.mubr.msk.bf16.vlgmr.msra.gmra.mrb[0].mxu0 %vm510_vm9, %v453_v32  ;;  %1172 = vmatmul.mubr.msk.bf16.vlgmr.msra.gmra.mrb[0].mxu1 %vm510_vm9, %v453_v32 }
 0x208   :  { %1100 = vmatprep.mubr.bf16.mxu0 %v1250_v14  ;;  %1141 = vmatprep.mubr.bf16.mxu1 %v1250_v14 }
 0x2da   :  { %v561_v37 = vpop.f32.mrb[0].mxu0  ;;  %v602_v33 = vpop.f32.mrb[0].mxu1 }
 0x2db   :  { %v617_v34 = vmul.f32 %v561_v37, %v561_v37  ;;  %v563_v35 = vpop.f32.mrb[1].mxu0  ;;  %v604_v39 = vpop.f32.mrb[1].mxu1  ;;  %v619_v40 = vmul.f32 %v602_v33, %v602_v33 }
 0x2dc   :  { %v611_v36 = vadd.f32 %v563_v35, %v561_v37  ;;  %v618_v41 = vmul.f32 %v563_v35, %v563_v35  ;;  %v565_v42 = vpop.f32.mrb[2].mxu0  ;;  %v606_v38 = vpop.f32.mrb[2].mxu1  ;;  %v620_v50 = vmul.f32 %v604_v39, %v604_v39 }
 0x2dd   :  { %v566_v43 = vpop.f32.mrb[3].mxu0  ;;  %v607_v44 = vpop.f32.mrb[3].mxu1 }
 0x2de   :  { %v612_v46 = vadd.f32 %v611_v36, %v602_v33  ;;  %v621_v48 = vadd.f32 %v618_v41, %v617_v34  ;;  %v715_v36 = vrot.slane %v698_v28, %v1425_v58  ;;  %v727_v43 = vrot.slane %v698_v28, %v1431_v1 }
 0x2df   :  { %v681_v44 = vrot.slane %v656_v27, %v1429_v0 }
 0x2e0   :  { %v613_v49 = vadd.f32 %v612_v46, %v604_v39  ;;  %v622_v51 = vadd.f32 %v621_v48, %v619_v40 }
 0x2e2   :  { %614 = vadd.xlane.f32.xlu1 %v613_v49  ;;  %v623_v52 = vadd.f32 %v622_v51, %v620_v50 }
 0x2e4   :  { %624 = vadd.xlane.f32.xlu0 %v623_v52 }
 0x36f   :  { %v615_v14 = vpop.xlane.xlu1 %614 }
 0x370   :  { %v616_v53 = vmul.f32 0.001953125, %v615_v14 }
 0x371   :  { %v625_v54 = vpop.xlane.xlu0 %624 }
 0x372   :  { %v627_v55 = vmul.f32 %v616_v53, %v616_v53  ;;  %v626_v59 = vmul.f32 0.001953125, %v625_v54 }
 0x374   :  { %v628_v60 = vsub.f32 %v626_v59, %v627_v55 }
 0x376   :  { %v629_v61 = vadd.f32 1e-05, %v628_v60 }
 0x378   :  { %1193 = vrsqrt.f32 %v629_v61 }
 0x382   :  { %v1194_v2 = vpop.eup %1193 }
 0x383   :  { %v631_v3 = vmul.f32 %v1194_v2, %v609_v63 }
 0x385   :  { %636 = vperm.xlu0 %1190, %v631_v3   ;;  %v632_v5 = vmul.f32 %v631_v3, %v616_v53 }
 0x387   :  { %v633_v7 = vsub.f32 %v610_v4, %v632_v5 }
 0x389   :  { %645 = vperm.xlu1 %1189, %v633_v7   ;;  %v740_v7 = vld [vmem:[#allocation3 + $0x2] ss:$8 sm:$0xf] }
 0x404   :  { %v637_v8 = vpop.permute.xlu0 %636 }
 0x405   :  { %v639_v9 = vmul.f32 %v637_v8, %v561_v37  ;;  %v641_v10 = vmul.f32 %v637_v8, %v602_v33  ;;  %v640_v6 = vmul.f32 %v637_v8, %v563_v35  ;;  %v642_v57 = vmul.f32 %v637_v8, %v604_v39  ;;  %v782_v8 = vld [vmem:[#allocation3 + $0x3] ss:$8 sm:$0xf] }
 0x406   :  { %v673_v37 = vrot.slane %v656_v27, %v1425_v58  ;;  %v685_v35 = vrot.slane %v656_v27, %v1431_v1  ;;  %v723_v39 = vrot.slane %v698_v28, %v1429_v0 }
 0x408   :  { %v646_v11 = vpop.permute.xlu1 %645 }
 0x409   :  { %v648_v62 = vadd.f32 %v646_v11, %v639_v9  ;;  %v650_v12 = vadd.f32 %v646_v11, %v641_v10  ;;  %v649_v13 = vadd.f32 %v646_v11, %v640_v6  ;;  %v651_v56 = vadd.f32 %v646_v11, %v642_v57 }
 0x40a   :  { %v761_v11 = vrot.slane %v740_v7, %v1413_v47  ;;  %v803_v6 = vrot.slane %v782_v8, %v1413_v47  ;;  %v769_v57 = vrot.slane %v740_v7, %v1431_v1 }
 0x40b   :  { %v1558_v15 = vmax.f32 %v648_v62, 0.0  ;;  %v1560_v16 = vmax.f32 %v650_v12, 0.0  ;;  %v1566_v17 = vmax.f32 %v649_v13, 0.0  ;;  %v1576_v18 = vmax.f32 %v651_v56, 0.0 }
 0x40c   :  { %v757_v12 = vrot.slane %v740_v7, %v1425_v58  ;;  %v807_v56 = vrot.slane %v782_v8, %v1429_v0 }
 0x40d   :  { %703 = vrot.lane.b32.xlu0 %v1560_v16, %s1249_s16  ;;  %657 = vrot.lane.b32.xlu1 %v1558_v15, %s1251_s2 }
 0x411   :  { %741 = vrot.lane.b32.xlu0 %v1558_v15, %s1252_s3  ;;  %659 = vrot.lane.b32.xlu1 %v1566_v17, %s1251_s2 }
 0x415   :  { %745 = vrot.lane.b32.xlu0 %v1560_v16, %s1252_s3  ;;  %661 = vrot.lane.b32.xlu1 %v1560_v16, %s1251_s2 }
 0x419   :  { %783 = vrot.lane.b32.xlu0 %v1558_v15, %s1253_s30  ;;  %663 = vrot.lane.b32.xlu1 %v1576_v18, %s1251_s2 }
 0x41d   :  { %787 = vrot.lane.b32.xlu0 %v1560_v16, %s1253_s30  ;;  %699 = vrot.lane.b32.xlu1 %v1558_v15, %s1249_s16 }
 0x421   :  { %829 = vrot.lane.b32.xlu0 %v1558_v15, %s1254_s9  ;;  %701 = vrot.lane.b32.xlu1 %v1566_v17, %s1249_s16 }
 0x425   :  { %833 = vrot.lane.b32.xlu0 %v1560_v16, %s1254_s9  ;;  %705 = vrot.lane.b32.xlu1 %v1576_v18, %s1249_s16 }
 0x429   :  { %871 = vrot.lane.b32.xlu0 %v1558_v15, %s1255_s10  ;;  %743 = vrot.lane.b32.xlu1 %v1566_v17, %s1252_s3 }
 0x42d   :  { %875 = vrot.lane.b32.xlu0 %v1560_v16, %s1255_s10  ;;  %747 = vrot.lane.b32.xlu1 %v1576_v18, %s1252_s3 }
 0x431   :  { %913 = vrot.lane.b32.xlu0 %v1558_v15, %s1256_s11  ;;  %785 = vrot.lane.b32.xlu1 %v1566_v17, %s1253_s30 }
 0x435   :  { %917 = vrot.lane.b32.xlu0 %v1560_v16, %s1256_s11  ;;  %789 = vrot.lane.b32.xlu1 %v1576_v18, %s1253_s30 }
 0x439   :  { %955 = vrot.lane.b32.xlu0 %v1558_v15, %s1257_s12  ;;  %831 = vrot.lane.b32.xlu1 %v1566_v17, %s1254_s9 }
 0x43d   :  { %959 = vrot.lane.b32.xlu0 %v1560_v16, %s1257_s12  ;;  %835 = vrot.lane.b32.xlu1 %v1576_v18, %s1254_s9 }
 0x441   :  { %873 = vrot.lane.b32.xlu1 %v1566_v17, %s1255_s10 }
 0x445   :  { %877 = vrot.lane.b32.xlu1 %v1576_v18, %s1255_s10 }
 0x449   :  { %915 = vrot.lane.b32.xlu1 %v1566_v17, %s1256_s11 }
 0x44d   :  { %919 = vrot.lane.b32.xlu1 %v1576_v18, %s1256_s11 }
 0x451   :  { %957 = vrot.lane.b32.xlu1 %v1566_v17, %s1257_s12 }
 0x455   :  { %961 = vrot.lane.b32.xlu1 %v1576_v18, %s1257_s12 }
 0x47f   :  { %v704_v19 = vpop.permute.xlu0 %703  ;;  %v658_v20 = vpop.permute.xlu1 %657 }
 0x483   :  { %v1630_v21 = vpop.permute.xlu0 %741  ;;  %v660_v22 = vpop.permute.xlu1 %659 }
 0x484   :  { %v667_v32 = vsel %vm107_vm0, %v658_v20, %v660_v22 }
 0x485   :  { %v691_v41 = vmul.f32 %v677_v30, %v667_v32  ;;  %v765_v30 = vrot.slane %v740_v7, %v1429_v0 }
 0x487   :  { %v1632_v23 = vpop.permute.xlu0 %745  ;;  %v662_v24 = vpop.permute.xlu1 %661 }
 0x488   :  { %v666_v49 = vsel %vm107_vm0, %v660_v22, %v662_v24  ;;  %v828_v22 = vld [vmem:[#allocation3 + $0x5] ss:$8 sm:$0xf] }
 0x489   :  { %v692_v63 = vmul.f32 %v681_v44, %v666_v49 }
 0x48b   :  { %v664_v25 = vpop.permute.xlu1 %663  ;;  %v1634_v26 = vpop.permute.xlu0 %783 }
 0x48c   :  { %v665_v46 = vsel %vm107_vm0, %v662_v24, %v664_v25  ;;  %v668_v48 = vsel %vm107_vm0, %v664_v25, %v658_v20  ;;  %v799_v20 = vrot.slane %v782_v8, %v1425_v58 }
 0x48d   :  { %v690_v54 = vmul.f32 %v673_v37, %v668_v48  ;;  %v693_v55 = vmul.f32 %v685_v35, %v665_v46 }
 0x48f   :  { %v700_v29 = vpop.permute.xlu1 %699  ;;  %v788_v33 = vpop.permute.xlu0 %787 }
 0x493   :  { %v702_v34 = vpop.permute.xlu1 %701  ;;  %v1660_v59 = vpop.permute.xlu0 %829 }
 0x494   :  { %v709_v40 = vsel %vm151_vm1, %v700_v29, %v702_v34  ;;  %v708_v42 = vsel %vm151_vm1, %v702_v34, %v704_v19 }
 0x495   :  { %v733_v38 = vmul.f32 %v719_v31, %v709_v40  ;;  %v734_v52 = vmul.f32 %v723_v39, %v708_v42  ;;  %v845_v39 = vrot.slane %v828_v22, %v1425_v58  ;;  %v849_v42 = vrot.slane %v828_v22, %v1413_v47 }
 0x497   :  { %v706_v50 = vpop.permute.xlu1 %705  ;;  %v1034_v51 = vpack.c.bf16 %v733_v38, %v691_v41  ;;  %v1035_v5 = vpack.c.bf16 %v734_v52, %v692_v63  ;;  %v834_v9 = vpop.permute.xlu0 %833  ;;  %v853_v52 = vrot.slane %v828_v22, %v1429_v0 }
 0x498   :  { %v707_v14 = vsel %vm151_vm1, %v704_v19, %v706_v50  ;;  %v710_v53 = vsel %vm151_vm1, %v706_v50, %v700_v29  ;;  %v811_v29 = vrot.slane %v782_v8, %v1431_v1 }
 0x499   :  { %v732_v60 = vmul.f32 %v715_v36, %v710_v53  ;;  %v735_v61 = vmul.f32 %v727_v43, %v707_v14  ;;  %1068 = vmatprep.subr.bf16.mxu0 %v1034_v51 }
 0x49b   :  { %v1033_v2 = vpack.c.bf16 %v732_v60, %v690_v54  ;;  %v744_v3 = vpop.permute.xlu1 %743  ;;  %v1036_v4 = vpack.c.bf16 %v735_v61, %v693_v55  ;;  %v1674_v24 = vpop.permute.xlu0 %871  ;;  %v857_v54 = vrot.slane %v828_v22, %v1431_v1 }
 0x49c   :  { %v751_v62 = vsel %vm195_vm2, %v1630_v21, %v744_v3  ;;  %v750_v37 = vsel %vm195_vm2, %v744_v3, %v1632_v23 }
 0x49d   :  { %1069 = vmatpush1.bf16.msra.mxu0 %v1033_v2  ;;  %1109 = vmatprep.subr.bf16.mxu1 %v1036_v4  ;;  %v775_v25 = vmul.f32 %v761_v11, %v751_v62 }
 0x49e   :  { %1110 = vmatpush1.bf16.msra.mxu1 %v1035_v5 }
 0x49f   :  { %v748_v10 = vpop.permute.xlu1 %747  ;;  %v876_v46 = vpop.permute.xlu0 %875 }
 0x4a0   :  { %v749_v31 = vsel %vm195_vm2, %v1632_v23, %v748_v10  ;;  %v752_v32 = vsel %vm195_vm2, %v748_v10, %v1630_v21  ;;  %v776_v23 = vmul.f32 %v765_v30, %v750_v37  ;;  %v870_v10 = vld [vmem:[#allocation3 + $0x6] ss:$8 sm:$0xf] }
 0x4a1   :  { %v774_v38 = vmul.f32 %v757_v12, %v752_v32  ;;  %v777_v21 = vmul.f32 %v769_v57, %v749_v31  ;;  %v899_v57 = vrot.slane %v870_v10, %v1431_v1  ;;  %v954_v32 = vld [vmem:[#allocation3 + $0x20] ss:$8 sm:$0xf] }
 0x4a3   :  { %v786_v13 = vpop.permute.xlu1 %785  ;;  %v914_v3 = vpop.permute.xlu0 %913 }
 0x4a4   :  { %v793_v19 = vsel %vm239_vm3, %v1634_v26, %v786_v13  ;;  %v792_v27 = vsel %vm239_vm3, %v786_v13, %v788_v33  ;;  %v895_v13 = vrot.slane %v870_v10, %v1429_v0 }
 0x4a5   :  { %v817_v28 = vmul.f32 %v803_v6, %v793_v19  ;;  %v818_v40 = vmul.f32 %v807_v56, %v792_v27  ;;  %v887_v6 = vrot.slane %v870_v10, %v1425_v58 }
 0x4a7   :  { %v790_v34 = vpop.permute.xlu1 %789  ;;  %v1038_v35 = vpack.c.bf16 %v817_v28, %v775_v25  ;;  %v1039_v51 = vpack.c.bf16 %v818_v40, %v776_v23  ;;  %v918_v11 = vpop.permute.xlu0 %917 }
 0x4a8   :  { %v791_v36 = vsel %vm239_vm3, %v788_v33, %v790_v34  ;;  %v794_v41 = vsel %vm239_vm3, %v790_v34, %v1634_v26 }
 0x4a9   :  { %v816_v43 = vmul.f32 %v799_v20, %v794_v41  ;;  %v819_v44 = vmul.f32 %v811_v29, %v791_v36  ;;  %1070 = vmatprep.subr.bf16.mxu0 %v1038_v35 }
 0x4ab   :  { %v1037_v48 = vpack.c.bf16 %v816_v43, %v774_v38  ;;  %v832_v49 = vpop.permute.xlu1 %831  ;;  %v1040_v50 = vpack.c.bf16 %v819_v44, %v777_v21  ;;  %v956_v27 = vpop.permute.xlu0 %955  ;;  %v975_v38 = vrot.slane %v954_v32, %v1413_v47 }
 0x4ac   :  { %v838_v33 = vsel %vm287_vm4, %v832_v49, %v834_v9  ;;  %v839_v26 = vsel %vm287_vm4, %v1660_v59, %v832_v49 }
 0x4ad   :  { %v862_v14 = vmul.f32 %v845_v39, %v839_v26  ;;  %v863_v53 = vmul.f32 %v849_v42, %v838_v33  ;;  %1071 = vmatpush1.bf16.msra.mxu0 %v1037_v48  ;;  %1111 = vmatprep.subr.bf16.mxu1 %v1040_v50  ;;  %v971_v42 = vrot.slane %v954_v32, %v1425_v58 }
 0x4ae   :  { %1112 = vmatpush1.bf16.msra.mxu1 %v1039_v51  ;;  %v983_v26 = vrot.slane %v954_v32, %v1431_v1 }
 0x4af   :  { %v1041_v55 = vpack.c.bf16 %v862_v14, %v1558_v15  ;;  %v836_v60 = vpop.permute.xlu1 %835  ;;  %v1042_v61 = vpack.c.bf16 %v863_v53, %v1566_v17  ;;  %v912_v17 = vld [vmem:[#allocation3 + $0x7] ss:$8 sm:$0xf] }
 0x4b0   :  { %v837_v63 = vsel %vm287_vm4, %v834_v9, %v836_v60  ;;  %v840_v2 = vsel %vm287_vm4, %v836_v60, %v1660_v59  ;;  %v891_v59 = vrot.slane %v870_v10, %v1413_v47  ;;  %v929_v62 = vrot.slane %v912_v17, %v1425_v58 }
 0x4b1   :  { %v864_v4 = vmul.f32 %v853_v52, %v837_v63  ;;  %v865_v5 = vmul.f32 %v857_v54, %v840_v2  ;;  %1072 = vmatprep.subr.bf16.mxu0 %v1042_v61  ;;  %v933_v12 = vrot.slane %v912_v17, %v1413_v47  ;;  %v937_v22 = vrot.slane %v912_v17, %v1429_v0 }
 0x4b2   :  { %1073 = vmatpush1.bf16.msra.mxu0 %v1041_v55  ;;  %v941_v25 = vrot.slane %v912_v17, %v1431_v1  ;;  %v979_v47 = vrot.slane %v954_v32, %v1429_v0  ;;  %v996_v0 = vld [vmem:[%s1790_s7] sm:$0xf] }
 0x4b3   :  { %v1043_v7 = vpack.c.bf16 %v864_v4, %v1560_v16  ;;  %v874_v8 = vpop.permute.xlu1 %873  ;;  %v1044_v15 = vpack.c.bf16 %v865_v5, %v1576_v18  ;;  %v1195_v4 = vld [vmem:[%s1783_s0] sm:$0xff] }
 0x4b4   :  { %v880_v16 = vsel %vm331_vm5, %v874_v8, %v876_v46  ;;  %v881_v18 = vsel %vm331_vm5, %v1674_v24, %v874_v8  ;;  %v1196_v8 = vld [vmem:[%s1783_s0 + $0x8] sm:$0xff] }
 0x4b5   :  { %1113 = vmatprep.subr.bf16.mxu1 %v1044_v15  ;;  %v904_v28 = vmul.f32 %v887_v6, %v881_v18  ;;  %v905_v29 = vmul.f32 %v891_v59, %v880_v16 }
 0x4b6   :  { %1114 = vmatpush1.bf16.msra.mxu1 %v1043_v7 }
 0x4b7   :  { %v878_v9 = vpop.permute.xlu1 %877 }
 0x4b8   :  { %v879_v37 = vsel %vm331_vm5, %v876_v46, %v878_v9  ;;  %v882_v34 = vsel %vm331_vm5, %v878_v9, %v1674_v24  ;;  %v960_v24 = vpop.permute.xlu0 %959  ;;  %v1197_v9 = vld [vmem:[%s1783_s0 + $0x10] sm:$0xff] }
 0x4b9   :  { %v906_v21 = vmul.f32 %v895_v13, %v879_v37  ;;  %v907_v43 = vmul.f32 %v899_v57, %v882_v34 }
 0x4bb   :  { %v916_v56 = vpop.permute.xlu1 %915 }
 0x4bc   :  { %v922_v19 = vsel %vm375_vm6, %v916_v56, %v918_v11  ;;  %v923_v20 = vsel %vm375_vm6, %v914_v3, %v916_v56 }
 0x4bd   :  { %v946_v30 = vmul.f32 %v929_v62, %v923_v20  ;;  %v947_v31 = vmul.f32 %v933_v12, %v922_v19  ;;  %v1198_v62 = vld [vmem:[%s1783_s0 + $0x18] sm:$0xff] }
 0x4bf   :  { %v1045_v35 = vpack.c.bf16 %v946_v30, %v904_v28  ;;  %v920_v39 = vpop.permute.xlu1 %919  ;;  %v1046_v40 = vpack.c.bf16 %v947_v31, %v905_v29 }
 0x4c0   :  { %v921_v36 = vsel %vm375_vm6, %v918_v11, %v920_v39  ;;  %v924_v41 = vsel %vm375_vm6, %v920_v39, %v914_v3 }
 0x4c1   :  { %v948_v44 = vmul.f32 %v937_v22, %v921_v36  ;;  %v949_v23 = vmul.f32 %v941_v25, %v924_v41  ;;  %1074 = vmatprep.subr.bf16.mxu0 %v1046_v40 }
 0x4c2   :  { %1075 = vmatpush1.bf16.msra.mxu0 %v1045_v35 }
 0x4c3   :  { %v1047_v46 = vpack.c.bf16 %v948_v44, %v906_v21  ;;  %v958_v48 = vpop.permute.xlu1 %957  ;;  %v1048_v49 = vpack.c.bf16 %v949_v23, %v907_v43 }
 0x4c4   :  { %v964_v50 = vsel %vm419_vm7, %v958_v48, %v960_v24  ;;  %v965_v51 = vsel %vm419_vm7, %v956_v27, %v958_v48 }
 0x4c5   :  { %v988_v33 = vmul.f32 %v971_v42, %v965_v51  ;;  %v989_v58 = vmul.f32 %v975_v38, %v964_v50  ;;  %1115 = vmatprep.subr.bf16.mxu1 %v1048_v49 }
 0x4c6   :  { %1116 = vmatpush1.bf16.msra.mxu1 %v1047_v46 }
 0x4c7   :  { %v1049_v52 = vpack.c.bf16 %v988_v33, %v988_v33  ;;  %v1050_v14 = vpack.c.bf16 %v989_v58, %v989_v58  ;;  %v962_v53 = vpop.permute.xlu1 %961 }
 0x4c8   :  { %v963_v54 = vsel %vm419_vm7, %v960_v24, %v962_v53  ;;  %v966_v55 = vsel %vm419_vm7, %v962_v53, %v956_v27 }
 0x4c9   :  { %v990_v60 = vmul.f32 %v979_v47, %v963_v54  ;;  %v991_v61 = vmul.f32 %v983_v26, %v966_v55  ;;  %1173 = vmatprep.subr.msk.bf16.mxu0 %vm514_vm8, %v1050_v14  ;;  %v1057_v63 = vsel %vm514_vm8, %v1049_v52, 0 }
 0x4ca   :  { %1077 = vmatpush1.bf16.msra.mxu0 %v1057_v63 }
 0x4cb   :  { %v1051_v1 = vpack.c.bf16 %v990_v60, %v990_v60  ;;  %v1052_v2 = vpack.c.bf16 %v991_v61, %v991_v61 }
 0x4cd   :  { %1175 = vmatprep.subr.msk.bf16.mxu1 %vm514_vm8, %v1052_v2  ;;  %1174 = vmatmul.mubr.msk.bf16.vlgmr.msra.gmra.mrb[4].mxu0 %vm510_vm9, %v996_v0  ;;  %v1063_v45 = vsel %vm514_vm8, %v1051_v1, 0 }
 0x4ce   :  { %1118 = vmatpush1.bf16.msra.mxu1 %v1063_v45 }
 0x4d1   :  { %1176 = vmatmul.mubr.msk.bf16.vlgmr.msra.gmra.mrb[4].mxu1 %vm510_vm9, %v996_v0 }
 0x5a0   :  { %v1102_v3 = vpop.f32.mrb[4].mxu0 }
 0x5a1   :  { %v1103_v5 = vadd.f32 %v1195_v4, %v1102_v3  ;;  %v1104_v7 = vpop.f32.mrb[5].mxu0 }
 0x5a2   :  { %v1105_v15 = vadd.f32 %v1196_v8, %v1104_v7  ;;  %v1106_v10 = vpop.f32.mrb[6].mxu0 }
 0x5a3   :  { %1150 = vst [vmem:[#allocation6] sm:$0xff] %v1103_v5  ;;  %v1107_v17 = vpop.f32.mrb[7].mxu0 }
 0x5a4   :  { %1151 = vst [vmem:[#allocation6 + $0x8] sm:$0xff] %v1105_v15  ;;  %v1143_v11 = vpop.f32.mrb[4].mxu1 }
 0x5a5   :  { %v1144_v6 = vadd.f32 %v1197_v9, %v1143_v11  ;;  %v1145_v59 = vpop.f32.mrb[5].mxu1 }
 0x5a6   :  { %v1146_v12 = vadd.f32 %v1198_v62, %v1145_v59  ;;  %v1147_v16 = vpop.f32.mrb[6].mxu1 }
 0x5a7   :  { %1152 = vst [vmem:[#allocation6 + $0x10] sm:$0xff] %v1144_v6  ;;  %v1148_v18 = vpop.f32.mrb[7].mxu1 }
 0x5a8   :  { %1153 = vst [vmem:[#allocation6 + $0x18] sm:$0xff] %v1146_v12 }
 0x5a9   :  { %1232 = shalt.err (!%p1229_p12)
}
 0x5aa   :  { %s1233_s29 = scalar_lea.hbm %s1791_s8, 512 }
 0x5ab   :  { %p1234_p13 = scmp.ne.s32.totalorder %s1791_s8, %s1233_s29  ;;  %p1237_p0 = scmp.lt.u32.totalorder %s1233_s29, %s1791_s8 }
 0x5ad   :  { %p1239_p1 = pnand %p1237_p0, %p1234_p13 }
 0x5af   :  { %1242 = shalt.err (!%p1239_p1)
}
 0x5b0   :  { %1163 = dma.vmem_to_hbm [thread:$0]  %s1161_s22, 512, %s1791_s8, [#allocation5]  }
 0x5b1   :  { %1245 = dma.done.wait [#allocation5], 512  }
 0x5b2   :  { %1246 = vsyncadd [#allocation5], 4294966784 }
 0x5b3   :  { %1167 = vsyncpa [#allocation4], 1 }
 0x5b4   :  { %1168 = vsyncpa [#allocation5], 1 }

</bundles_post_ra>
